<compile_context>
chip_gen: v7x
topology: tpu7x:2x2x1
jax: 0.10.0
libtpu: 0.0.40
codegen_flags: <defaults>
</compile_context>

<pallas_src>
import functools

import jax
import jax.numpy as jnp
from jax.experimental import pallas as pl
from jax.experimental.pallas import tpu as pltpu


# ----------------------------- Pallas kernel ------------------------------ #
def _proj_kernel(w_ref, a_ref, b_ref, o_ref):
    # w_ref: [N, K]        (full weight, grid-invariant -> DMA'd once)
    # a_ref: [1, K, T]     (one batch, one spatial tile of im2col'd input)
    # b_ref: [N, 1]        (bias, grid-invariant)
    # o_ref: [1, N, T]     (lane-dense output tile, already NCHW-ordered)
    acc = jnp.dot(w_ref[...], a_ref[0], preferred_element_type=jnp.float32)
    o_ref[0] = (acc + b_ref[...].astype(jnp.float32)).astype(o_ref.dtype)


def _proj_matmul_t(a_t, w_r, bias, *, max_tile=2048, out_dtype=None):
    """a_t: [B, K, S], w_r: [N, K], bias: [N, 1] -> [B, N, S] via Pallas."""
    B, K, S = a_t.shape
    N = w_r.shape[0]
    out_dtype = a_t.dtype if out_dtype is None else out_dtype

    # Lane-dense spatial tile (multiple of 128).  grid_s = cdiv(S, tile_s):
    # the last block may be partial; Pallas masks the OOB output columns and
    # the OOB (garbage) input columns only feed those dropped columns.
    tile_s = min(max_tile, pl.cdiv(S, 128) * 128)
    # v7x megacore: with B == 1 keep >= 2 grid steps so both TCs get work.
    if B == 1 and tile_s > 128 and pl.cdiv(S, tile_s) < 2:
        tile_s = pl.cdiv(pl.cdiv(S, 2), 128) * 128
    grid_s = pl.cdiv(S, tile_s)

    return pl.pallas_call(
        _proj_kernel,
        out_shape=jax.ShapeDtypeStruct((B, N, S), out_dtype),
        grid_spec=pltpu.PrefetchScalarGridSpec(
            num_scalar_prefetch=0,
            grid=(B, grid_s),
            in_specs=[
                # Weight / bias index_maps are constant -> fetched once,
                # never re-DMA'd across grid steps.
                pl.BlockSpec((N, K), lambda b, s: (0, 0)),
                pl.BlockSpec((1, K, tile_s), lambda b, s: (b, 0, s)),
                pl.BlockSpec((N, 1), lambda b, s: (0, 0)),
            ],
            out_specs=pl.BlockSpec((1, N, tile_s), lambda b, s: (b, 0, s)),
        ),
        compiler_params=pltpu.CompilerParams(
            # Both axes independent -> megacore sharding on v7x (2 TCs).
            dimension_semantics=("parallel", "parallel"),
            # ~19 MiB needed at tile 2048; 48 MiB leaves headroom and stays
            # within v7x's 64 MiB physical VMEM.
            vmem_limit_bytes=48 << 20,
        ),
    )(w_r, a_t, bias)


# ------------------------------- JAX glue ---------------------------------- #
def _im2col_t(x, kh, kw, sh, sw, ph, pw):
    """x: [B, C, H, W] -> A_T: [B, C*kh*kw, Ho*Wo] (no transposes needed)."""
    B, C, H, W = x.shape
    if kh == 1 and kw == 1 and sh == 1 and sw == 1 and ph == 0 and pw == 0:
        # 1x1 conv, stride 1: A_T is just the input viewed as [B, C, H*W].
        return x.reshape(B, C, H * W), H, W
    xp = jnp.pad(x, ((0, 0), (0, 0), (ph, ph), (pw, pw)))
    Hp, Wp = H + 2 * ph, W + 2 * pw
    Ho = (Hp - kh) // sh + 1
    Wo = (Wp - kw) // sw + 1
    cols = []
    for i in range(kh):
        for j in range(kw):
            # strided window for kernel offset (i, j): [B, C, Ho, Wo]
            cols.append(xp[:, :, i:i + sh * Ho:sh, j:j + sw * Wo:sw])
    # [B, C, kh*kw, Ho, Wo] -> [B, C*kh*kw, Ho*Wo]
    # K ordering c*kh*kw + i*kw + j matches flattened conv weight [N, C, kh, kw].
    col = jnp.stack(cols, axis=2).reshape(B, C * kh * kw, Ho * Wo)
    return col, Ho, Wo


class PatchEmbedPallas:
    """Pallas/JAX equivalent of the PyTorch PatchEmbed module."""

    def __init__(self, patch_size=1, stride=1, padding=0,
                 in_chans=4, embed_dim=768, key=None, dtype=jnp.float32,
                 out_dtype=None):
        self.kh = self.kw = int(patch_size)
        self.sh = self.sw = int(stride)
        self.ph = self.pw = int(padding)
        self.in_chans = in_chans
        self.embed_dim = embed_dim
        self.out_dtype = out_dtype  # None -> same dtype as the input

        key = jax.random.PRNGKey(0) if key is None else key
        kw_, kb_ = jax.random.split(key)
        fan_in = in_chans * self.kh * self.kw
        bound = 1.0 / (fan_in ** 0.5)
        # Conv2d weight [out, in, kh, kw], bias [out]  (PyTorch-style uniform init)
        self.weight = jax.random.uniform(
            kw_, (embed_dim, in_chans, self.kh, self.kw),
            minval=-bound, maxval=bound, dtype=dtype)
        self.bias = jax.random.uniform(
            kb_, (embed_dim,), minval=-bound, maxval=bound, dtype=dtype)
        # norm_layer=None -> Identity (no parameters, no-op)

    @functools.partial(jax.jit, static_argnums=0)
    def __call__(self, x):
        # x: [B, C, H, W]  (NCHW, matching the PyTorch module)
        B = x.shape[0]
        a_t, Ho, Wo = _im2col_t(x, self.kh, self.kw, self.sh, self.sw,
                                self.ph, self.pw)               # [B, K, S]
        w_r = self.weight.reshape(self.embed_dim, -1)            # [N, K]
        b = self.bias.reshape(self.embed_dim, 1)                 # [N, 1]
        out = _proj_matmul_t(a_t, w_r, b, out_dtype=self.out_dtype)  # [B, N, S]
        # Already channel-major: final reshape to NCHW is free.
        return out.reshape(B, self.embed_dim, Ho, Wo)


# --------------------------------- main ------------------------------------ #
if __name__ == "__main__":
    key = jax.random.PRNGKey(0)
    k_x, k_p, k_p2 = jax.random.split(key, 3)

    # Small shapes consistent with the module defaults (in_chans=4), but with
    # a modest embed_dim to keep things tiny: B=2, C=4, H=W=16, embed_dim=32.
    B, C, H, W = 2, 4, 16, 16
    embed_dim = 32
    x = jax.random.normal(k_x, (B, C, H, W), dtype=jnp.float32)

    # --- Default config (patch_size=1, stride=1, padding=0) ---
    mod = PatchEmbedPallas(patch_size=1, stride=1, padding=0,
                           in_chans=C, embed_dim=embed_dim, key=k_p)
    y = mod(x)
    jax.block_until_ready(y)

    y_ref = jax.lax.conv_general_dilated(
        x, mod.weight, window_strides=(mod.sh, mod.sw),
        padding=[(mod.ph, mod.ph), (mod.pw, mod.pw)],
        dimension_numbers=("NCHW", "OIHW", "NCHW"),
    ) + mod.bias.reshape(1, embed_dim, 1, 1)
    assert y.shape == (B, embed_dim, H // mod.sh, W // mod.sw)
    assert jnp.allclose(y, y_ref, atol=1e-4, rtol=1e-4)

    # --- Poolformer-stem config (k=7, s=4, p=2): exercises the general
    #     im2col K ordering and the ragged / partial spatial tile path. ---
    mod2 = PatchEmbedPallas(patch_size=7, stride=4, padding=2,
                            in_chans=C, embed_dim=embed_dim, key=k_p2)
    y2 = mod2(x)
    jax.block_until_ready(y2)

    y2_ref = jax.lax.conv_general_dilated(
        x, mod2.weight, window_strides=(mod2.sh, mod2.sw),
        padding=[(mod2.ph, mod2.ph), (mod2.pw, mod2.pw)],
        dimension_numbers=("NCHW", "OIHW", "NCHW"),
        precision=jax.lax.Precision.HIGHEST,
    ) + mod2.bias.reshape(1, embed_dim, 1, 1)
    assert y2.shape == y2_ref.shape
    assert jnp.allclose(y2, y2_ref, atol=1e-3, rtol=1e-3)

    print("KERNEL_OK")
</pallas_src>

<mosaic_0001>
module attributes {stable_mosaic.version = 11 : i64} {
  func.func @_proj_kernel(%arg0: i32, %arg1: i32, %arg2: memref<32x4xf32, #tpu.memory_space<vmem>>, %arg3: memref<1x4x256xf32, #tpu.memory_space<vmem>>, %arg4: memref<32x1xf32, #tpu.memory_space<vmem>>, %arg5: memref<1x32x256xf32, #tpu.memory_space<vmem>>) attributes {dimension_semantics = [#tpu.dimension_semantics<parallel>, #tpu.dimension_semantics<parallel>], iteration_bounds = array<i64: 2, 1>, scalar_prefetch = 0 : i64, scratch_operands = 0 : i64, tpu.core_type = #tpu.core_type<tc>, window_params = [{pipeline_mode = #tpu.pipeline_mode<synchronous>, transform_indices = @transform_0, window_bounds = array<i64: 32, 4>}, {transform_indices = @transform_1, window_bounds = array<i64: 1, 4, 256>}, {pipeline_mode = #tpu.pipeline_mode<synchronous>, transform_indices = @transform_2, window_bounds = array<i64: 32, 1>}, {transform_indices = @transform_3, window_bounds = array<i64: 1, 32, 256>}]} {
    %c0 = arith.constant 0 : index
    %c0_0 = arith.constant 0 : index
    %0 = vector.load %arg2[%c0, %c0_0] : memref<32x4xf32, #tpu.memory_space<vmem>>, vector<32x4xf32>
    %c0_1 = arith.constant 0 : index
    %c0_2 = arith.constant 0 : index
    %c0_3 = arith.constant 0 : index
    %1 = vector.load %arg3[%c0_1, %c0_2, %c0_3] : memref<1x4x256xf32, #tpu.memory_space<vmem>>, vector<1x4x256xf32>
    %2 = vector.shape_cast %1 : vector<1x4x256xf32> to vector<4x256xf32>
    %cst = arith.constant dense<0.000000e+00> : vector<32x256xf32>
    %3 = tpu.matmul %0, %2, %cst {dimension_numbers = #tpu.dot_dimension_numbers<[1], [0], [0], [1], [0, 0, 1, 1], [], []>} : vector<32x4xf32>, vector<4x256xf32>, vector<32x256xf32> -> vector<32x256xf32>
    %c0_4 = arith.constant 0 : index
    %c0_5 = arith.constant 0 : index
    %4 = vector.load %arg4[%c0_4, %c0_5] : memref<32x1xf32, #tpu.memory_space<vmem>>, vector<32x1xf32>
    %5 = vector.broadcast %4 : vector<32x1xf32> to vector<32x256xf32>
    %6 = arith.addf %3, %5 : vector<32x256xf32>
    %c0_6 = arith.constant 0 : index
    %c0_7 = arith.constant 0 : index
    %c0_8 = arith.constant 0 : index
    %7 = vector.load %arg5[%c0_6, %c0_7, %c0_8] : memref<1x32x256xf32, #tpu.memory_space<vmem>>, vector<1x32x256xf32>
    %8 = vector.shape_cast %7 : vector<1x32x256xf32> to vector<32x256xf32>
    %9 = vector.shape_cast %6 : vector<32x256xf32> to vector<1x32x256xf32>
    tpu.vector_store %arg5[%c0_6, %c0_7, %c0_8], %9 {strides = array<i32>} : memref<1x32x256xf32, #tpu.memory_space<vmem>>, vector<1x32x256xf32>,
    return
  }
  func.func @transform_0(%arg0: i32, %arg1: i32) -> (i32, i32) {
    %c0_i32 = arith.constant 0 : i32
    %c0_i32_0 = arith.constant 0 : i32
    %c0_i32_1 = arith.constant 0 : i32
    return %c0_i32, %c0_i32_0 : i32, i32
  }
  func.func @transform_1(%arg0: i32, %arg1: i32) -> (i32, i32, i32) {
    %c0_i32 = arith.constant 0 : i32
    %c0_i32_0 = arith.constant 0 : i32
    return %arg0, %c0_i32, %arg1 : i32, i32, i32
  }
  func.func @transform_2(%arg0: i32, %arg1: i32) -> (i32, i32) {
    %c0_i32 = arith.constant 0 : i32
    %c0_i32_0 = arith.constant 0 : i32
    %c0_i32_1 = arith.constant 0 : i32
    return %c0_i32, %c0_i32_0 : i32, i32
  }
  func.func @transform_3(%arg0: i32, %arg1: i32) -> (i32, i32, i32) {
    %c0_i32 = arith.constant 0 : i32
    %c0_i32_0 = arith.constant 0 : i32
    return %arg0, %c0_i32, %arg1 : i32, i32, i32
  }
}

</mosaic_0001>

<bundles_post_ra>
// kernel: a_call__.1
= control target key start
LH: loop header
LB: loop body
LE: loop exit
PB: predicated region body
PF: predicated region fallthrough
CT: control target
= control target key end

     0   :  { %s539_s12 = smov 0   ;;  %s541_s13 = smov 0   ;;  %s600_s0 = inlined_call_operand.vmem [shape: f32[32,4], index: 0, kind: input, shape index: {}]   ;;  %s601_s1 = inlined_call_operand.vmem [shape: f32[2,4,256], index: 1, kind: input, shape index: {}]   ;;  %s602_s2 = inlined_call_operand.vmem [shape: f32[32,1], index: 2, kind: input, shape index: {}]   ;;  %s603_s3 = inlined_call_operand.vmem [shape: f32[2,32,256], index: 3, kind: output, shape index: {}]  }
   0x1   :  { %s543_s14 = smov 0  }
   0x2 LB: > { %s25_s15 = sadd.s32 1, %s511_s13  ;;  %p447_p0 = scmp.ge.s32.totalorder %s515_s14, 1  ;;  %s515_s14 = sphi %s543_s14, %s13_s14   ;;  %s511_s13 = sphi %s541_s13, %s605_s13   ;;  %s507_s12 = sphi %s539_s12, %s604_s12  }
   0x3   : > { %p27_p1 = scmp.ge.s32.totalorder %s25_s15, 2  ;;  %p158_p2 = scmp.lt.s32.totalorder %s515_s14, 3 }
   0x5   : > { %s607_s15 = smov (%p27_p1, %s25_s15), 0  ;;  %p159_p3 = pnand %p447_p0, %p158_p2 }
   0x6   : > { %p191_p4 = scmp.lt.s32.totalorder (!%p159_p3), %s507_s12, 1  ;;  %v517_v0 = vmov (!%p159_p3), 0.0   ;;  %v217_v1 = vld [vmem:[%s602_s2 + $0x10] sm:$0xff] (!%p159_p3)  ;;  %v518_v2 = vmov (!%p159_p3), 0   ;;  %v215_v3 = vld [vmem:[%s602_s2] sm:$0xff] (!%p159_p3)  ;;  %v218_v4 = vld [vmem:[%s602_s2 + $0x18] sm:$0xff] (!%p159_p3) }
   0x7   : > { %162 = sbr.rel (%p159_p3) target bundleno = 242 (0xf2), region = 32  ;;  %323 = vmatprep.mubr.f32.mxu0 (!%p159_p3), %v517_v0  ;;  %335 = vmatprep.mubr.f32.mxu1 (!%p159_p3), %v517_v0  ;;  %v216_v5 = vld [vmem:[%s602_s2 + $0x8] sm:$0xff] (!%p159_p3)  ;;  %vm254_vm0 = vcmask (!%p159_p3), 1043456   ;;  %v210_v8 = vld [vmem:[%s600_s0] sm:$0xff] (!%p159_p3)  ;;  %vm241_vm1 = vcmask (!%p159_p3), 31744   ;;  %v212_v9 = vld [vmem:[%s600_s0 + $0x10] sm:$0xff] (!%p159_p3) }
   0x8   : > { %491 = vset.pattern.permute.xlu1 (!%p159_p3), %v518_v2  ;;  %490 = vset.pattern.permute.xlu0 (!%p159_p3), %v518_v2  ;;  %v211_v10 = vld [vmem:[%s600_s0 + $0x8] sm:$0xff] (!%p159_p3)  ;;  %v213_v11 = vld [vmem:[%s600_s0 + $0x18] sm:$0xff] (!%p159_p3) }
   0x9   : > { %231 = vperm.xlu1 (!%p159_p3), %491, %v217_v1   ;;  %221 = vperm.xlu0 (!%p159_p3), %490, %v215_v3  }
   0xd   : > { %236 = vperm.xlu1 (!%p159_p3), %491, %v218_v4   ;;  %226 = vperm.xlu0 (!%p159_p3), %490, %v216_v5  }
   0xe   : > { %s609_s12 = smov (!%p191_p4, %s507_s12), 1 }
   0xf   : > { %s460_s20 = sshll.u32 %s609_s12, 3  ;;  %s461_s9 = sshll.u32 %s609_s12, 6 }
  0x10   : > { %s198_s27 = scalar_lea.vmem %s601_s1, %s460_s20  ;;  %s208_s16 = scalar_lea.vmem %s603_s3, %s461_s9 }
  0x11   : > { %v214_v6 = vld [vmem:[%s198_s27] sm:$0xff] }
  0x12   : > { %v240_v7 = vcombine.high %v214_v6, %v214_v6 }
  0x14   : > { %452 = vmatprep.subr.msk.mxu0 %vm254_vm0, %v240_v7  ;;  %462 = vmatprep.subr.msk.mxu1 %vm254_vm0, %v240_v7 }
  0x15   : > { %453 = vmatpush1.msk.msra.mxu0 %vm254_vm0, %v214_v6  ;;  %463 = vmatpush1.msk.msra.mxu1 %vm254_vm0, %v214_v6 }
  0x16   : > { %454 = vmatmul.mubr.msk.f32.vlgmr.msra.gmra.mrb[0].mxu0 %vm241_vm1, %v210_v8  ;;  %456 = vmatmul.mubr.msk.f32.vlgmr.msra.gmra.mrb[0].mxu1 %vm241_vm1, %v212_v9 }
  0x17   : > { %329 = vmatprep.mubr.f32.mxu0 %v517_v0  ;;  %341 = vmatprep.mubr.f32.mxu1 %v517_v0 }
  0x1a   : > { %455 = vmatmul.mubr.msk.f32.gmra.mrb[2].mxu0 %vm241_vm1, %v211_v10  ;;  %457 = vmatmul.mubr.msk.f32.gmra.mrb[2].mxu1 %vm241_vm1, %v213_v11 }
  0x88   : > { %v232_v12 = vpop.permute.xlu1 %231  ;;  %v222_v13 = vpop.permute.xlu0 %221 }
  0x8c   : > { %v237_v22 = vpop.permute.xlu1 %236  ;;  %v227_v23 = vpop.permute.xlu0 %226 }
  0xe9   : > { %v325_v14 = vpop.f32.mrb[0].mxu0  ;;  %v337_v15 = vpop.f32.mrb[0].mxu1 }
  0xea   : > { %v326_v16 = vadd.f32 %v325_v14, %v222_v13  ;;  %v338_v17 = vadd.f32 %v337_v15, %v232_v12  ;;  %v327_v18 = vpop.f32.mrb[1].mxu0  ;;  %v339_v19 = vpop.f32.mrb[1].mxu1 }
  0xeb   : > { %v328_v20 = vadd.f32 %v327_v18, %v222_v13  ;;  %v340_v21 = vadd.f32 %v339_v19, %v232_v12 }
  0xec   : > { %348 = vst [vmem:[%s208_s16] sm:$0xff] %v326_v16  ;;  %352 = vst [vmem:[%s208_s16 + $0x20] sm:$0xff] %v338_v17 }
  0xed   : > { %349 = vst [vmem:[%s208_s16 + $0x8] sm:$0xff] %v328_v20  ;;  %353 = vst [vmem:[%s208_s16 + $0x28] sm:$0xff] %v340_v21  ;;  %v331_v24 = vpop.f32.mrb[2].mxu0  ;;  %v343_v25 = vpop.f32.mrb[2].mxu1 }
  0xee   : > { %v332_v26 = vadd.f32 %v331_v24, %v227_v23  ;;  %v344_v27 = vadd.f32 %v343_v25, %v237_v22  ;;  %v333_v28 = vpop.f32.mrb[3].mxu0  ;;  %v345_v29 = vpop.f32.mrb[3].mxu1 }
  0xef   : > { %v334_v30 = vadd.f32 %v333_v28, %v227_v23  ;;  %v346_v31 = vadd.f32 %v345_v29, %v237_v22 }
  0xf0   : > { %350 = vst [vmem:[%s208_s16 + $0x10] sm:$0xff] %v332_v26  ;;  %354 = vst [vmem:[%s208_s16 + $0x30] sm:$0xff] %v344_v27 }
  0xf1   : > { %351 = vst [vmem:[%s208_s16 + $0x18] sm:$0xff] %v334_v30  ;;  %355 = vst [vmem:[%s208_s16 + $0x38] sm:$0xff] %v346_v31 }
  0xf2 PF: > { %s13_s14 = sadd.s32 1, %s515_s14   ;;  %s604_s12 = smov %s511_s13 }
  0xf3   : > { %p10_p5 = scmp.ge.s32.totalorder %s13_s14, 4   ;;  %s605_s13 = smov %s607_s15 }
  0xf5   :  { %12 = sbr.rel (!%p10_p5) target bundleno = 2 (0x2), region = 62 }

</bundles_post_ra>
